<compile_context>
chip_gen: v6e
topology: v6e:2x2x1
jax: 0.10.0
libtpu: 0.0.40
codegen_flags: <defaults>
</compile_context>

<pallas_src>
import functools

import numpy as np

import jax
import jax.numpy as jnp
from jax.experimental import pallas as pl
from jax.experimental.pallas import tpu as pltpu

EPS = 1e-6                         # nn.LayerNorm(eps=1e-6) in DINOv2
VMEM_LIMIT = 48 * 1024 * 1024      # headroom under v7x 64 MiB physical VMEM / core
NEG_INF = -1e30                    # additive key-mask (scores stay f32)


def _gelu(x):
    # exact (erf) GELU, matching torch.nn.GELU default — kept in f32
    return 0.5 * x * (1.0 + jax.lax.erf(x * 0.7071067811865476))


def _layernorm(x, g, b):
    mu = jnp.mean(x, axis=-1, keepdims=True)
    xc = x - mu
    var = jnp.mean(xc * xc, axis=-1, keepdims=True)
    return xc * jax.lax.rsqrt(var + EPS) * g + b


# ----------------------- patch-embed matmul kernel -----------------------
def patch_embed_kernel(x_ref, w_ref, b_ref, o_ref):
    o_ref[...] = (
        jnp.dot(x_ref[...], w_ref[...], preferred_element_type=jnp.float32)
        + b_ref[...]
    )


def patch_embed(x_flat_bf16, w_bf16, b, *, tile_m=1024):
    """x_flat_bf16: [M, K_pad] bf16, w_bf16: [K_pad, D] bf16 -> [M, D] f32."""
    M, K = x_flat_bf16.shape
    D = w_bf16.shape[1]
    tm = min(tile_m, M)                      # row-tiled so DMA overlaps compute
    return pl.pallas_call(
        patch_embed_kernel,
        out_shape=jax.ShapeDtypeStruct((M, D), jnp.float32),
        grid=(pl.cdiv(M, tm),),
        in_specs=[
            pl.BlockSpec((tm, K), lambda i: (i, 0)),
            pl.BlockSpec((K, D), lambda i: (0, 0)),
            pl.BlockSpec((1, D), lambda i: (0, 0)),
        ],
        out_specs=pl.BlockSpec((tm, D), lambda i: (i, 0)),
        compiler_params=pltpu.CompilerParams(
            dimension_semantics=("parallel",),
            vmem_limit_bytes=VMEM_LIMIT,
        ),
    )(x_flat_bf16, w_bf16, b)


# ------------- fused ViT-layers kernel (grid = (num_b_tiles, L)) -------------
def vit_layers_kernel(
    slot_ref, sel_ref,                                     # SMEM scalar-prefetch
    tok_ref, cls_ref, pos_ref, kbias_ref,                  # tokens + invariants
    g1_ref, b1_ref, wqkv_ref, bqkv_ref, wproj_ref, bproj_ref, ls1_ref,
    g2_ref, b2_ref, wfc1_ref, bfc1_ref, wfc2_ref, bfc2_ref, ls2_ref,
    normg_ref, normb_ref,                                  # [1, D] f32
    o_ref,                                                 # [B_tile, 1, N, D]
    xs_ref,                                                # VMEM carry [B_tile, T_pad, D]
    *, num_heads, num_valid,
):
    del slot_ref                               # only used by the output index_map
    l = pl.program_id(1)
    Bt, T_pad, D = xs_ref.shape
    N = o_ref.shape[2]
    dh = D // num_heads
    M = Bt * T_pad

    # layer 0 of each batch tile: fused cls concat + pos-embed add + padding.
    # token order is patches-first, cls-last (attention is permutation-equivariant),
    # so the output write later is simply rows [:N].
    @pl.when(l == 0)
    def _():
        xs_ref[:, :N, :] = tok_ref[...] + pos_ref[0, :N, :]
        xs_ref[:, N:N + 1, :] = jnp.broadcast_to(
            cls_ref[...] + pos_ref[:, N:N + 1, :], (Bt, 1, D))
        if T_pad > num_valid:                  # static
            xs_ref[:, num_valid:, :] = jnp.zeros(
                (Bt, T_pad - num_valid, D), jnp.float32)

    x = xs_ref[...].reshape(M, D)              # [B_tile*T_pad, D] f32

    # ---------------- MHSA (pre-LN, LayerScale) ----------------
    xn = _layernorm(x, g1_ref[0], b1_ref[0])
    qkv = (
        jnp.dot(xn.astype(jnp.bfloat16), wqkv_ref[0],
                preferred_element_type=jnp.float32)
        + bqkv_ref[0]
    )                                          # [M, 3D]; q columns pre-scaled
    kbias = kbias_ref[...]                     # [1, T_pad] additive key mask (f32)

    attn_rows = []
    for bi in range(Bt):                       # static unrolled per-element attention
        qkv_b = qkv[bi * T_pad:(bi + 1) * T_pad]
        q = qkv_b[:, 0 * D:1 * D].reshape(T_pad, num_heads, dh).astype(jnp.bfloat16)
        k = qkv_b[:, 1 * D:2 * D].reshape(T_pad, num_heads, dh).astype(jnp.bfloat16)
        v = qkv_b[:, 2 * D:3 * D].reshape(T_pad, num_heads, dh).astype(jnp.bfloat16)
        # all heads in one batched MXU pass
        s = jnp.einsum("qhd,khd->hqk", q, k, preferred_element_type=jnp.float32)
        s = s + kbias                          # broadcast [1,T_pad] over [h,q,k]
        s = s - jnp.max(s, axis=-1, keepdims=True)
        p = jnp.exp(s)
        p = p * pl.reciprocal(jnp.sum(p, axis=-1, keepdims=True), approx=True)
        a = jnp.einsum("hqk,khd->qhd", p.astype(jnp.bfloat16), v,
                       preferred_element_type=jnp.float32).reshape(T_pad, D)
        attn_rows.append(a)
    attn = attn_rows[0] if Bt == 1 else jnp.concatenate(attn_rows, axis=0)

    attn = (
        jnp.dot(attn.astype(jnp.bfloat16), wproj_ref[0],
                preferred_element_type=jnp.float32)
        + bproj_ref[0]
    )
    x = x + ls1_ref[0] * attn                  # LayerScale ls1

    # ---------------- MLP (pre-LN, GELU, LayerScale) ----------------
    xn2 = _layernorm(x, g2_ref[0], b2_ref[0])
    h1 = (
        jnp.dot(xn2.astype(jnp.bfloat16), wfc1_ref[0],
                preferred_element_type=jnp.float32)
        + bfc1_ref[0]
    )
    h1 = _gelu(h1)
    h2 = (
        jnp.dot(h1.astype(jnp.bfloat16), wfc2_ref[0],
                preferred_element_type=jnp.float32)
        + bfc2_ref[0]
    )
    x = x + ls2_ref[0] * h2                    # LayerScale ls2

    xs_ref[...] = x.reshape(Bt, T_pad, D)      # carry tokens to the next layer

    # only selected intermediate layers pay the final LayerNorm + HBM write;
    # cls + pad rows are dropped in-kernel, store is in the caller's dtype.
    @pl.when(sel_ref[l] == 1)
    def _():
        xo = x.reshape(Bt, T_pad, D)[:, :N, :]
        xo = _layernorm(xo, normg_ref[...], normb_ref[...])
        o_ref[...] = xo.reshape(o_ref.shape).astype(o_ref.dtype)


def run_vit_layers(tok, p, cfg, *, num_valid, b_tile, out_dtype):
    """tok: [B_pad, N, D] f32 patch embeddings -> [B_pad, L_sel, N, D] out_dtype."""
    B_pad, N, D = tok.shape
    L = p["wqkv"].shape[0]
    T_pad = p["pos_full"].shape[1]
    nb = B_pad // b_tile

    # layer-selection tables (scalar-prefetched into SMEM). Output slots follow
    # block order, matching DINOv2 get_intermediate_layers with a tuple arg.
    sel_sorted = sorted({int(i) for i in cfg["intermediate_layers"]})
    assert sel_sorted and all(0 <= i < L for i in sel_sorted)
    L_sel = len(sel_sorted)
    is_sel_np = np.zeros((L,), np.int32)
    out_slot_np = np.zeros((L,), np.int32)
    s = -1
    for li in range(L):
        if li in sel_sorted:
            s += 1
            is_sel_np[li] = 1
        out_slot_np[li] = max(s, 0)
    out_slot = jnp.asarray(out_slot_np)
    is_sel = jnp.asarray(is_sel_np)

    layer_inputs = [
        p["g1"], p["b1"], p["wqkv"], p["bqkv"], p["wproj"], p["bproj"], p["ls1"],
        p["g2"], p["b2"], p["wfc1"], p["bfc1"], p["wfc2"], p["bfc2"], p["ls2"],
    ]

    def per_layer(a):
        blk = (1,) + tuple(a.shape[1:])
        return pl.BlockSpec(blk, lambda b, l, *_: (l, 0, 0))

    in_specs = [
        pl.BlockSpec((b_tile, N, D), lambda b, l, *_: (b, 0, 0)),   # tokens (per b-tile)
        pl.BlockSpec((1, 1, D), lambda b, l, *_: (0, 0, 0)),        # cls token
        pl.BlockSpec((1, T_pad, D), lambda b, l, *_: (0, 0, 0)),    # pos embed (reordered)
        pl.BlockSpec((1, T_pad), lambda b, l, *_: (0, 0)),          # additive key mask
    ]
    in_specs += [per_layer(a) for a in layer_inputs]                # streamed layer stack
    in_specs += [
        pl.BlockSpec((1, D), lambda b, l, *_: (0, 0)),              # final-norm gamma
        pl.BlockSpec((1, D), lambda b, l, *_: (0, 0)),              # final-norm beta
    ]

    grid_spec = pltpu.PrefetchScalarGridSpec(
        num_scalar_prefetch=2,
        grid=(nb, L),
        in_specs=in_specs,
        out_specs=pl.BlockSpec(
            (b_tile, 1, N, D),
            lambda b, l, slot_ref, sel_ref: (b, slot_ref[l], 0, 0)),
        scratch_shapes=[pltpu.VMEM((b_tile, T_pad, D), jnp.float32)],
    )

    kernel = functools.partial(
        vit_layers_kernel, num_heads=cfg["heads"], num_valid=num_valid)

    return pl.pallas_call(
        kernel,
        out_shape=jax.ShapeDtypeStruct((B_pad, L_sel, N, D), out_dtype),
        grid_spec=grid_spec,
        compiler_params=pltpu.CompilerParams(
            dimension_semantics=("parallel", "arbitrary"),
            vmem_limit_bytes=VMEM_LIMIT,
        ),
    )(out_slot, is_sel, tok, p["cls_token"], p["pos_full"], p["key_bias"],
      *layer_inputs, p["norm_g"], p["norm_b"])


# ----------------------- full backbone forward -----------------------
def dinov2_backbone_forward(x, prepped, cfg):
    """x: [B, C, H, W] (NCHW, like the PyTorch module). Returns [B, L_sel, N, D]."""
    out_dtype = x.dtype
    B, C, H, W = x.shape
    P = cfg["patch"]
    GH, GW = H // P, W // P
    N = GH * GW
    D = cfg["dim"]
    T = N + 1
    assert T == prepped["num_tokens"]
    K = C * P * P
    K_pad = prepped["k_pad"]

    # unfold to patches (conv2d k=s=14 equivalent), flatten in (C, ph, pw) order,
    # pad the contraction dim to a 128 multiple (lane-aligned MXU K feed)
    patches = x.astype(jnp.float32).reshape(B, C, GH, P, GW, P)
    patches = patches.transpose(0, 2, 4, 1, 3, 5).reshape(B * N, K)
    patches = jnp.pad(patches, ((0, 0), (0, K_pad - K)))

    tok = patch_embed(patches.astype(jnp.bfloat16),
                      prepped["w_patch"], prepped["b_patch"])
    tok = tok.reshape(B, N, D)
    # TODO(synk): positional-embedding bicubic interpolation for non-native
    # resolutions is not implemented (inputs here match the native grid).

    # batch tiling amortises the per-layer weight stream over b_tile elements.
    b_tile = int(cfg.get("b_tile", min(B, 8)))
    nb = pl.cdiv(B, b_tile)
    B_pad = nb * b_tile
    if B_pad > B:
        tok = jnp.pad(tok, ((0, B_pad - B), (0, 0), (0, 0)))

    out = run_vit_layers(tok, prepped, cfg,
                         num_valid=T, b_tile=b_tile, out_dtype=out_dtype)
    return out[:B]                             # drop batch padding (if any)


# ----------------------- deterministic synthetic params -----------------------
def init_params(key, cfg, in_chans, num_tokens):
    D = cfg["dim"]
    P = cfg["patch"]
    hid = cfg["mlp_ratio"] * D
    keys = jax.random.split(key, 4 + cfg["depth"])

    def nrm(k, shape):
        return jax.random.normal(k, shape, jnp.float32) * 0.02

    params = dict(
        # equivalent to conv weight [D, C, P, P] reshaped/transposed to [C*P*P, D]
        w_patch=nrm(keys[0], (in_chans * P * P, D)),
        b_patch=jnp.zeros((1, D), jnp.float32),
        cls_token=nrm(keys[1], (1, 1, D)),
        pos_embed=nrm(keys[2], (1, num_tokens, D)),
        norm_g=jnp.ones((1, D), jnp.float32),
        norm_b=jnp.zeros((1, D), jnp.float32),
        blocks=[],
    )
    for i in range(cfg["depth"]):
        bk = jax.random.split(keys[4 + i], 4)
        params["blocks"].append(dict(
            g1=jnp.ones((1, D), jnp.float32), b1=jnp.zeros((1, D), jnp.float32),
            wqkv=nrm(bk[0], (D, 3 * D)), bqkv=jnp.zeros((1, 3 * D), jnp.float32),
            wproj=nrm(bk[1], (D, D)), bproj=jnp.zeros((1, D), jnp.float32),
            ls1=jnp.full((1, D), 0.1, jnp.float32),
            g2=jnp.ones((1, D), jnp.float32), b2=jnp.zeros((1, D), jnp.float32),
            wfc1=nrm(bk[2], (D, hid)), bfc1=jnp.zeros((1, hid), jnp.float32),
            wfc2=nrm(bk[3], (hid, D)), bfc2=jnp.zeros((1, D), jnp.float32),
            ls2=jnp.full((1, D), 0.1, jnp.float32),
        ))
    return params


def prepare_params(params, cfg):
    """Stack per-layer params on a leading L axis, fold the attention scale into
    the q columns of wqkv/bqkv, reorder+pad the pos embed to the patches-first /
    cls-last layout, build the additive key mask, pad the patch-embed K dim to a
    128 multiple, and cast all MXU weight operands to bf16."""
    D = cfg["dim"]
    scale = (D // cfg["heads"]) ** -0.5
    blocks = params["blocks"]
    T = params["pos_embed"].shape[1]
    T_pad = ((T + 7) // 8) * 8
    K = params["w_patch"].shape[0]
    K_pad = ((K + 127) // 128) * 128

    def stack(name):
        return jnp.stack([b[name] for b in blocks], axis=0)

    wqkv = stack("wqkv")                       # [L, D, 3D]
    bqkv = stack("bqkv")                       # [L, 1, 3D]
    wqkv = wqkv.at[:, :, :D].multiply(scale)   # fold dh**-0.5 into q (free at runtime)
    bqkv = bqkv.at[:, :, :D].multiply(scale)

    pos = params["pos_embed"]                  # [1, T, D]: [cls, patches...]
    pos_full = jnp.concatenate(                # -> [patches..., cls, pad] (T_pad rows)
        [pos[:, 1:], pos[:, :1], jnp.zeros((1, T_pad - T, D), jnp.float32)], axis=1)

    key_bias = jnp.where(jnp.arange(T_pad) < T, 0.0, NEG_INF)
    key_bias = key_bias.astype(jnp.float32).reshape(1, T_pad)

    w_patch = jnp.pad(params["w_patch"], ((0, K_pad - K), (0, 0)))

    return dict(
        w_patch=w_patch.astype(jnp.bfloat16),
        b_patch=params["b_patch"],
        cls_token=params["cls_token"],
        pos_full=pos_full,
        key_bias=key_bias,
        norm_g=params["norm_g"], norm_b=params["norm_b"],
        g1=stack("g1"), b1=stack("b1"),
        wqkv=wqkv.astype(jnp.bfloat16), bqkv=bqkv,
        wproj=stack("wproj").astype(jnp.bfloat16), bproj=stack("bproj"),
        ls1=stack("ls1"),
        g2=stack("g2"), b2=stack("b2"),
        wfc1=stack("wfc1").astype(jnp.bfloat16), bfc1=stack("bfc1"),
        wfc2=stack("wfc2").astype(jnp.bfloat16), bfc2=stack("bfc2"),
        ls2=stack("ls2"),
        num_tokens=T, k_pad=K_pad,
    )


if __name__ == "__main__":
    # small synthetic ViT config (stands in for dinov2_vitb14):
    cfg = dict(
        patch=14, dim=32, heads=4, depth=4, mlp_ratio=4,
        intermediate_layers=tuple(range(4)),   # analogous to range(12) default
        b_tile=2,                              # batch-tiled weight streaming
    )
    B, C, H, W = 2, 3, 28, 28                  # 2x2 = 4 patches of 14x14
    N = (H // cfg["patch"]) * (W // cfg["patch"])
    T = N + 1

    key = jax.random.PRNGKey(0)
    k_params, k_x = jax.random.split(key)
    params = init_params(k_params, cfg, C, T)
    prepped = prepare_params(params, cfg)
    x = jax.random.normal(k_x, (B, C, H, W), jnp.float32)

    out = dinov2_backbone_forward(x, prepped, cfg)
    out = jax.block_until_ready(out)

    assert out.shape == (B, len(cfg["intermediate_layers"]), N, cfg["dim"]), out.shape
    assert out.dtype == x.dtype
    assert bool(jnp.all(jnp.isfinite(out)))
    print("KERNEL_OK")
</pallas_src>

<mosaic_0001>
module attributes {stable_mosaic.version = 11 : i64} {
  func.func @patch_embed_kernel(%arg0: i32, %arg1: memref<8x640xbf16, #tpu.memory_space<vmem>>, %arg2: memref<640x32xbf16, #tpu.memory_space<vmem>>, %arg3: memref<1x32xf32, #tpu.memory_space<vmem>>, %arg4: memref<8x32xf32, #tpu.memory_space<vmem>>) attributes {dimension_semantics = [#tpu.dimension_semantics<parallel>], iteration_bounds = array<i64: 1>, scalar_prefetch = 0 : i64, scratch_operands = 0 : i64, tpu.core_type = #tpu.core_type<tc>, window_params = [{transform_indices = @transform_0, window_bounds = array<i64: 8, 640>}, {pipeline_mode = #tpu.pipeline_mode<synchronous>, transform_indices = @transform_1, window_bounds = array<i64: 640, 32>}, {pipeline_mode = #tpu.pipeline_mode<synchronous>, transform_indices = @transform_2, window_bounds = array<i64: 1, 32>}, {transform_indices = @transform_3, window_bounds = array<i64: 8, 32>}]} {
    %c0 = arith.constant 0 : index
    %c0_0 = arith.constant 0 : index
    %0 = vector.load %arg1[%c0, %c0_0] : memref<8x640xbf16, #tpu.memory_space<vmem>>, vector<8x640xbf16>
    %c0_1 = arith.constant 0 : index
    %c0_2 = arith.constant 0 : index
    %1 = vector.load %arg2[%c0_1, %c0_2] : memref<640x32xbf16, #tpu.memory_space<vmem>>, vector<640x32xbf16>
    %cst = arith.constant dense<0.000000e+00> : vector<8x32xf32>
    %2 = tpu.matmul %0, %1, %cst {dimension_numbers = #tpu.dot_dimension_numbers<[1], [0], [0], [1], [0, 0, 1, 1], [], []>} : vector<8x640xbf16>, vector<640x32xbf16>, vector<8x32xf32> -> vector<8x32xf32>
    %c0_3 = arith.constant 0 : index
    %c0_4 = arith.constant 0 : index
    %3 = vector.load %arg3[%c0_3, %c0_4] : memref<1x32xf32, #tpu.memory_space<vmem>>, vector<1x32xf32>
    %4 = vector.broadcast %3 : vector<1x32xf32> to vector<8x32xf32>
    %5 = arith.addf %2, %4 : vector<8x32xf32>
    %c0_5 = arith.constant 0 : index
    %c0_6 = arith.constant 0 : index
    %6 = vector.load %arg4[%c0_5, %c0_6] : memref<8x32xf32, #tpu.memory_space<vmem>>, vector<8x32xf32>
    tpu.vector_store %arg4[%c0_5, %c0_6], %5 {strides = array<i32>} : memref<8x32xf32, #tpu.memory_space<vmem>>, vector<8x32xf32>,
    return
  }
  func.func @transform_0(%arg0: i32) -> (i32, i32) {
    %c0_i32 = arith.constant 0 : i32
    %c0_i32_0 = arith.constant 0 : i32
    return %arg0, %c0_i32 : i32, i32
  }
  func.func @transform_1(%arg0: i32) -> (i32, i32) {
    %c0_i32 = arith.constant 0 : i32
    %c0_i32_0 = arith.constant 0 : i32
    %c0_i32_1 = arith.constant 0 : i32
    return %c0_i32, %c0_i32_0 : i32, i32
  }
  func.func @transform_2(%arg0: i32) -> (i32, i32) {
    %c0_i32 = arith.constant 0 : i32
    %c0_i32_0 = arith.constant 0 : i32
    %c0_i32_1 = arith.constant 0 : i32
    return %c0_i32, %c0_i32_0 : i32, i32
  }
  func.func @transform_3(%arg0: i32) -> (i32, i32) {
    %c0_i32 = arith.constant 0 : i32
    %c0_i32_0 = arith.constant 0 : i32
    return %arg0, %c0_i32 : i32, i32
  }
}

</mosaic_0001>

<bundles_post_ra>
// kernel: tpu_custom_call.1
= control target key start
LH: loop header
LB: loop body
LE: loop exit
PB: predicated region body
PF: predicated region fallthrough
CT: control target
= control target key end

     0   :  { %v689_v35 = vmov 0.0   ;;  %vm690_vm0 = vmmov 0   ;;  %s847_s0 = inlined_call_operand.vmem [shape: bf16[8,640], index: 0, kind: input, shape index: {}]   ;;  %s848_s1 = inlined_call_operand.vmem [shape: bf16[640,32], index: 1, kind: input, shape index: {}]   ;;  %s849_s2 = inlined_call_operand.vmem [shape: f32[1,32], index: 2, kind: input, shape index: {}]   ;;  %s850_s3 = inlined_call_operand.hbm [shape: f32[8,32], index: 3, kind: output, shape index: {}]  }
   0x1   :  { %v622_v0 = vld [vmem:[%s848_s1 + $0x78] sm:$0xff]   ;;  %v626_v4 = vld [vmem:[%s848_s1 + $0x70] sm:$0xff]   ;;  %v630_v8 = vld [vmem:[%s848_s1 + $0x68] sm:$0xff]  }
   0x2   :  { %v623_v1 = vld [vmem:[%s848_s1 + $0x38] sm:$0xff]   ;;  %546 = vmatprep.subr.bf16.mxu0 %v622_v0  ;;  %v627_v5 = vld [vmem:[%s848_s1 + $0x30] sm:$0xff]   ;;  %v631_v9 = vld [vmem:[%s848_s1 + $0x28] sm:$0xff]  }
   0x3   :  { %v624_v2 = vld [vmem:[%s848_s1 + $0xf8] sm:$0xff]   ;;  %547 = vmatpush3.bf16.msra.mxu0 %v623_v1  ;;  %v628_v6 = vld [vmem:[%s848_s1 + $0xf0] sm:$0xff]   ;;  %v632_v10 = vld [vmem:[%s848_s1 + $0xe8] sm:$0xff]  }
   0x4   :  { %v625_v3 = vld [vmem:[%s848_s1 + $0xb8] sm:$0xff]   ;;  %568 = vmatprep.subr.bf16.mxu1 %v624_v2  ;;  %548 = vmatprep.subr.bf16.mxu0 %v626_v4  ;;  %v629_v7 = vld [vmem:[%s848_s1 + $0xb0] sm:$0xff]   ;;  %v633_v11 = vld [vmem:[%s848_s1 + $0xa8] sm:$0xff]  }
   0x5   :  { %569 = vmatpush3.bf16.msra.mxu1 %v625_v3  ;;  %v634_v12 = vld [vmem:[%s848_s1 + $0x60] sm:$0xff]   ;;  %v638_v16 = vld [vmem:[%s848_s1 + $0x58] sm:$0xff]   ;;  %v642_v20 = vld [vmem:[%s848_s1 + $0x50] sm:$0xff]  }
   0x6   :  { %570 = vmatprep.subr.bf16.mxu1 %v628_v6  ;;  %v635_v13 = vld [vmem:[%s848_s1 + $0x20] sm:$0xff]   ;;  %v639_v17 = vld [vmem:[%s848_s1 + $0x18] sm:$0xff]   ;;  %v643_v21 = vld [vmem:[%s848_s1 + $0x10] sm:$0xff]  }
   0x7   :  { %549 = vmatpush3.bf16.msra.mxu0 %v627_v5  ;;  %v636_v14 = vld [vmem:[%s848_s1 + $0xe0] sm:$0xff]   ;;  %v640_v18 = vld [vmem:[%s848_s1 + $0xd8] sm:$0xff]   ;;  %v644_v22 = vld [vmem:[%s848_s1 + $0xd0] sm:$0xff]  }
   0x8   :  { %550 = vmatprep.subr.bf16.mxu0 %v630_v8  ;;  %v637_v15 = vld [vmem:[%s848_s1 + $0xa0] sm:$0xff]   ;;  %v641_v19 = vld [vmem:[%s848_s1 + $0x98] sm:$0xff]   ;;  %v645_v23 = vld [vmem:[%s848_s1 + $0x90] sm:$0xff]  }
   0x9   :  { %571 = vmatpush3.bf16.msra.mxu1 %v629_v7  ;;  %v646_v24 = vld [vmem:[%s848_s1 + $0x48] sm:$0xff]   ;;  %v650_v28 = vld [vmem:[%s848_s1 + $0x40] sm:$0xff]   ;;  %v658_v39 = vld [vmem:[%s848_s1 + $0x138] sm:$0xff]  }
   0xa   :  { %572 = vmatprep.subr.bf16.mxu1 %v632_v10  ;;  %v647_v25 = vld [vmem:[%s848_s1 + $0x8] sm:$0xff]   ;;  %v651_v29 = vld [vmem:[%s848_s1] sm:$0xff]   ;;  %v659_v40 = vld [vmem:[%s848_s1 + $0x130] sm:$0xff]  }
   0xb   :  { %551 = vmatpush3.bf16.msra.mxu0 %v631_v9  ;;  %v648_v26 = vld [vmem:[%s848_s1 + $0xc8] sm:$0xff]   ;;  %v652_v30 = vld [vmem:[%s848_s1 + $0xc0] sm:$0xff]  }
   0xc   :  { %552 = vmatprep.subr.bf16.mxu0 %v634_v12  ;;  %v649_v27 = vld [vmem:[%s848_s1 + $0x88] sm:$0xff]   ;;  %v16_v31 = vld [vmem:[%s847_s0] sm:$0xff] }
   0xd   :  { %573 = vmatpush3.bf16.msra.mxu1 %v633_v11  ;;  %v501_v32 = vcombine.low %v16_v31, %v16_v31  ;;  %v502_v33 = vcombine.high %v16_v31, %v16_v31  ;;  %v655_v34 = vld [vmem:[%s848_s1 + $0x80] sm:$0xff]   ;;  %v17_v36 = vld [vmem:[%s847_s0 + $0x8] sm:$0xff] }
   0xe   :  { %574 = vmatprep.subr.bf16.mxu1 %v636_v14  ;;  %v503_v37 = vcombine.low %v17_v36, %v17_v36  ;;  %v504_v38 = vcombine.high %v17_v36, %v17_v36  ;;  %v660_v41 = vld [vmem:[%s848_s1 + $0x128] sm:$0xff]  }
   0xf   :  { %553 = vmatpush3.bf16.msra.mxu0 %v635_v13  ;;  %396 = vmatprep.mubr.bf16.mxu0 %v502_v33 }
  0x10   :  { %554 = vmatprep.subr.bf16.mxu0 %v638_v16  ;;  %436 = vmatprep.mubr.bf16.mxu1 %v504_v38 }
  0x11   :  { %575 = vmatpush3.bf16.msra.mxu1 %v637_v15 }
  0x12   :  { %576 = vmatprep.subr.bf16.mxu1 %v640_v18 }
  0x13   :  { %555 = vmatpush3.bf16.msra.mxu0 %v639_v17 }
  0x14   :  { %556 = vmatprep.subr.bf16.mxu0 %v642_v20 }
  0x15   :  { %577 = vmatpush3.bf16.msra.mxu1 %v641_v19 }
  0x16   :  { %578 = vmatprep.subr.bf16.mxu1 %v644_v22 }
  0x17   :  { %557 = vmatpush3.bf16.msra.mxu0 %v643_v21 }
  0x18   :  { %558 = vmatprep.subr.bf16.mxu0 %v646_v24 }
  0x19   :  { %579 = vmatpush3.bf16.msra.mxu1 %v645_v23 }
  0x1a   :  { %580 = vmatprep.subr.bf16.mxu1 %v648_v26 }
  0x1b   :  { %559 = vmatpush3.bf16.msra.mxu0 %v647_v25 }
  0x1c   :  { %560 = vmatprep.subr.bf16.mxu0 %v650_v28 }
  0x1d   :  { %581 = vmatpush3.bf16.msra.mxu1 %v649_v27 }
  0x1e   :  { %582 = vmatprep.subr.bf16.mxu1 %v652_v30 }
  0x1f   :  { %561 = vmatpush3.bf16.msra.mxu0 %v651_v29 }
  0x20   :  { %599 = vmatprep.subr.bf16.mxu0 %v689_v35 }
  0x21   :  { %583 = vmatpush3.bf16.msra.mxu1 %v655_v34 }
  0x22   :  { %397 = vmatmul.mubr.bf16.vlgmr.msra.gmra.mxu0 %v501_v32 }
  0x23   :  { %600 = vmatpush3.bf16.msra.mxu0 %v658_v39  ;;  %615 = vmatprep.mubr.msk.bf16.mxu0 %vm690_vm0, %v689_v35 }
  0x24   :  { %437 = vmatmul.mubr.bf16.vlgmr.msra.gmra.mxu1 %v503_v37  ;;  %601 = vmatprep.subr.bf16.mxu0 %v689_v35 }
  0x27   :  { %602 = vmatpush3.bf16.msra.mxu0 %v659_v40 }
  0x28   :  { %603 = vmatprep.subr.bf16.mxu0 %v689_v35 }
  0x29   :  { %8 = vsyncpa [#allocation3], 0  ;;  %v661_v42 = vld [vmem:[%s848_s1 + $0x120] sm:$0xff]   ;;  %v662_v43 = vld [vmem:[%s848_s1 + $0x118] sm:$0xff]   ;;  %vm484_vm1 = vcmask 261120  }
  0x2a   :  { %v663_v44 = vld [vmem:[%s848_s1 + $0x110] sm:$0xff]   ;;  %v664_v45 = vld [vmem:[%s848_s1 + $0x108] sm:$0xff]   ;;  %v665_v46 = vld [vmem:[%s848_s1 + $0x100] sm:$0xff]   ;;  %s691_s1 = smov [#allocation2]  }
  0x2b   :  { %604 = vmatpush3.bf16.msra.mxu0 %v660_v41  ;;  %v666_v47 = vld [vmem:[%s847_s0 + $0x10] ss:$0 sps:$4 sm:$0xff]   ;;  %v500_v57 = vld [vmem:[%s849_s2] ss:$0 sm:$0xff]  ;;  %s492_s19 = sshll.u32 %s691_s1, 4  ;;  %s493_s19 = int_to_ptr.vmem [resolvable:$true] %s492_s19 }
  0x2c   :  { %605 = vmatprep.subr.bf16.mxu0 %v689_v35  ;;  %s667_s0 = scalar_lea.vmem %s493_s19, 128  ;;  %p672_p1 = scmp.lt.s32.totalorder %s493_s19, %s493_s19 }
  0x2d   :  { %p668_p0 = scmp.ne.s32.totalorder %s493_s19, %s667_s0  ;;  %p673_p2 = scmp.lt.s32.totalorder %s667_s0, %s667_s0 }
  0x2f   :  { %606 = vmatpush3.bf16.msra.mxu0 %v661_v42  ;;  %p674_p3 = por %p673_p2, %p672_p1 }
  0x30   :  { %607 = vmatprep.subr.bf16.mxu0 %v689_v35 }
  0x31   :  { %p675_p4 = pnand %p674_p3, %p668_p0 }
  0x33   :  { %608 = vmatpush3.bf16.msra.mxu0 %v662_v43 }
  0x34   :  { %609 = vmatprep.subr.bf16.mxu0 %v689_v35 }
  0x37   :  { %610 = vmatpush3.bf16.msra.mxu0 %v663_v44 }
  0x38   :  { %611 = vmatprep.subr.bf16.mxu0 %v689_v35 }
  0x3b   :  { %612 = vmatpush3.bf16.msra.mxu0 %v664_v45 }
  0x3c   :  { %613 = vmatprep.subr.bf16.mxu0 %v689_v35 }
  0x3f   :  { %614 = vmatpush3.bf16.msra.mxu0 %v665_v46 }
  0x42   :  { %616 = vmatmul.mubr.bf16.vlgmr.msra.gmra.mxu0 %v666_v47 }
  0xe2   :  { %v562_v48 = vpop.f32.mrf.mxu0 }
  0xe4   :  { %v563_v49 = vpop.f32.mrf.mxu0  ;;  %v584_v50 = vpop.f32.mrf.mxu1 }
  0xe5   :  { %v564_v56 = vadd.f32 %v563_v49, %v562_v48 }
  0xe6   :  { %v565_v51 = vpop.f32.mrf.mxu0  ;;  %v585_v52 = vpop.f32.mrf.mxu1 }
  0xe7   :  { %v399_v58 = vadd.f32 %v564_v56, %v500_v57  ;;  %v586_v59 = vadd.f32 %v585_v52, %v584_v50 }
  0xe8   :  { %v566_v53 = vpop.f32.mrf.mxu0  ;;  %v587_v54 = vpop.f32.mrf.mxu1 }
  0xe9   :  { %v439_v60 = vadd.f32 %v586_v59, %v399_v58 }
  0xea   :  { %v588_v55 = vpop.f32.mrf.mxu1 }
 0x102   :  { %v478_v61 = vpop.f32.mrf.mxu0 }
 0x103   :  { %v479_v62 = vadd.f32 %v478_v61, %v439_v60 }
 0x104   :  { %v617_v63 = vpop.f32.mrf.mxu0 }
 0x105   :  { %485 = vst.msk [vmem:[#allocation2] sm:$0xff] %vm484_vm1, %v479_v62 }
 0x106   :  { %v481_v0 = vpop.f32.mrf.mxu0 }
 0x107   :  { %678 = shalt.err (!%p675_p4)
}
 0x108   :  { %495 = dma.vmem_to_hbm [thread:$0]  %s493_s19, 128, %s850_s3, [#allocation3]   ;;  %v618_v1 = vpop.f32.mrf.mxu0 }
 0x109   :  { %687 = dma.done.wait [#allocation3], 128  }
 0x10a   :  { %688 = vsyncadd [#allocation3], 4294967168 }
 0x10b   :  { %499 = vsyncpa [#allocation3], 1 }

</bundles_post_ra>
